<compile_context>
chip_gen: v6e
topology: v6e:2x2x1
jax: 0.10.0
libtpu: 0.0.40
codegen_flags: <defaults>
</compile_context>

<pallas_src>
import functools

import jax
import jax.numpy as jnp
from jax import lax
from jax.experimental import pallas as pl
from jax.experimental.pallas import tpu as pltpu


_TARGET_TILE_BYTES = 4 * 1024 * 1024    # few-MiB tiles keep DMA near HBM roofline


def _vmem_budget_bytes() -> int:
    """3/4 of physical VMEM, capped at 96 MiB (=> ~48 MiB on v7x, 96 MiB on v5e/v6e)."""
    try:
        cap = int(pltpu.get_tpu_info().vmem_capacity_bytes)
    except Exception:
        cap = 64 * 1024 * 1024          # conservative fallback (v7x per-TC)
    return min((cap * 3) // 4, 96 * 1024 * 1024)


def _ls_ce_kernel(logits_ref, target_ref, out_ref, *,
                  smoothing: float, total_rows: int, block_rows: int):
    i = pl.program_id(0)

    x = logits_ref[...].astype(jnp.float32)                    # (BN, C)
    bn, c = x.shape

    # Numerically-stable logsumexp along classes (lane axis); no logprobs array.
    m = jnp.max(x, axis=-1, keepdims=True)                     # (BN, 1)
    sumexp = jnp.sum(jnp.exp(x - m), axis=-1, keepdims=True)   # (BN, 1)
    lse = m + jnp.log(sumexp)                                  # (BN, 1)

    # Fused weighted reduce: loss = lse - sum_c w_c * x_c,
    #   w_c = smoothing/C + (1-smoothing) * [c == target].
    tgt = target_ref[...].astype(jnp.int32)                    # (BN, 1)
    col = lax.broadcasted_iota(jnp.int32, (1, c), 1)           # (1, C) -> broadcast vs tgt
    base = jnp.float32(smoothing / c)
    w = jnp.where(col == tgt, jnp.float32(1.0 - smoothing) + base, base)   # (BN, C)
    wsum = jnp.sum(w * x, axis=-1, keepdims=True)              # (BN, 1)
    loss = lse - wsum                                          # (BN, 1)

    # Mask rows past the original N (partial last block carries garbage rows).
    row = i * block_rows + lax.broadcasted_iota(jnp.int32, (bn, 1), 0)
    loss = jnp.where(row < total_rows, loss, 0.0)

    # Lane-dense per-block partial sum (unmasked full-vreg store).
    out_ref[...] = jnp.full(out_ref.shape, jnp.sum(loss), dtype=jnp.float32)


def label_smoothing_cross_entropy(logits, target, *, smoothing: float = 0.1,
                                  block_rows: int | None = None):
    """logits: (N, C) float (f32 or bf16); target: (N,) int. Returns scalar f32 mean loss.

    On v5e/v6e/v7x prefer bf16 logits from the caller (kernel upcasts to f32
    internally) — the kernel is HBM-bound at f32 and bf16 halves input bytes.
    """
    assert smoothing < 1.0
    n, c = logits.shape
    dtype_bytes = jnp.dtype(logits.dtype).itemsize
    c_pad = -(-c // 128) * 128           # lane-padded class width actually resident
    budget = _vmem_budget_bytes()

    if block_rows is None:
        # Byte-driven tile sizing: ~4 MiB logits tile, capped so that
        # 2x double-buffered input + ~3 f32 working copies fit the VMEM budget,
        # and capped at ~cdiv(N,2) so moderate N still yields >=2 parallel blocks
        # (megacore sharding on v7x).
        bytes_per_row_resident = (2 * dtype_bytes + 3 * 4) * c_pad
        max_rows_vmem = max(8, budget // bytes_per_row_resident)
        target_rows = max(8, _TARGET_TILE_BYTES // (c_pad * dtype_bytes))
        block_rows = min(target_rows, max_rows_vmem)
        if n > 8:
            half = ((((n + 1) // 2) + 7) // 8) * 8
            block_rows = min(block_rows, half)

    if block_rows >= n:
        block_rows = n                   # single block: full-dim sublane OK
    else:
        block_rows = max(8, (block_rows // 8) * 8)

    num_blocks = -(-n // block_rows)     # no wrapper padding: partial last block + mask

    target2d = target.astype(jnp.int32).reshape(n, 1)

    br_pad = -(-block_rows // 8) * 8
    vmem_need = (2 * br_pad * c_pad * dtype_bytes    # double-buffered logits tile
                 + 3 * br_pad * c_pad * 4            # f32 working copies (x, w, exp)
                 + (2 << 20))                        # targets, outputs, misc headroom
    vmem_limit = int(min(max(vmem_need, 32 << 20), budget))

    kernel = functools.partial(_ls_ce_kernel, smoothing=float(smoothing),
                               total_rows=n, block_rows=block_rows)

    cost = pl.CostEstimate(
        flops=6 * n * c,
        transcendentals=n * c,
        bytes_accessed=n * c * dtype_bytes + n * 4 + num_blocks * 8 * 128 * 4,
    )

    partial = pl.pallas_call(
        kernel,
        out_shape=jax.ShapeDtypeStruct((num_blocks, 8, 128), jnp.float32),
        grid_spec=pltpu.PrefetchScalarGridSpec(
            num_scalar_prefetch=0,
            grid=(num_blocks,),
            in_specs=[
                pl.BlockSpec((block_rows, c), lambda i: (i, 0)),
                pl.BlockSpec((block_rows, 1), lambda i: (i, 0)),
            ],
            out_specs=pl.BlockSpec((1, 8, 128), lambda i: (i, 0, 0)),
        ),
        compiler_params=pltpu.CompilerParams(
            dimension_semantics=("parallel",),   # independent blocks -> megacore on v7x
            vmem_limit_bytes=vmem_limit,
        ),
        cost_estimate=cost,
    )(logits, target2d)

    return jnp.sum(partial[:, 0, 0]) / jnp.float32(n)


def _reference(logits, target, smoothing=0.1):
    logprobs = jax.nn.log_softmax(logits.astype(jnp.float32), axis=-1)
    nll = -jnp.take_along_axis(logprobs, target[:, None], axis=-1)[:, 0]
    smooth = -jnp.mean(logprobs, axis=-1)
    loss = (1.0 - smoothing) * nll + smoothing * smooth
    return jnp.mean(loss)


if __name__ == "__main__":
    key = jax.random.PRNGKey(0)
    k_x, k_t, k_x2, k_t2, k_x3, k_t3 = jax.random.split(key, 6)

    # Primary small case: batch of 8 samples, 32 classes (single block).
    N, C = 8, 32
    logits = jax.random.normal(k_x, (N, C), dtype=jnp.float32)
    target = jax.random.randint(k_t, (N,), 0, C, dtype=jnp.int32)
    loss = jax.block_until_ready(label_smoothing_cross_entropy(logits, target, smoothing=0.1))
    ref = _reference(logits, target, smoothing=0.1)
    assert jnp.allclose(loss, ref, atol=1e-5, rtol=1e-5), (loss, ref)

    # Multi-block grid + ragged tail (N not a block multiple), no wrapper padding.
    N2, C2 = 300, 128
    logits2 = jax.random.normal(k_x2, (N2, C2), dtype=jnp.float32)
    target2 = jax.random.randint(k_t2, (N2,), 0, C2, dtype=jnp.int32)
    loss2 = jax.block_until_ready(
        label_smoothing_cross_entropy(logits2, target2, smoothing=0.1, block_rows=64))
    ref2 = _reference(logits2, target2, smoothing=0.1)
    assert jnp.allclose(loss2, ref2, atol=1e-5, rtol=1e-5), (loss2, ref2)

    # bf16-input path (recommended caller contract) + auto half-cap => 2 blocks.
    N3, C3 = 48, 256
    logits3 = jax.random.normal(k_x3, (N3, C3), dtype=jnp.float32).astype(jnp.bfloat16)
    target3 = jax.random.randint(k_t3, (N3,), 0, C3, dtype=jnp.int32)
    loss3 = jax.block_until_ready(
        label_smoothing_cross_entropy(logits3, target3, smoothing=0.1))
    ref3 = _reference(logits3, target3, smoothing=0.1)
    assert jnp.allclose(loss3, ref3, atol=1e-4, rtol=1e-4), (loss3, ref3)

    print("KERNEL_OK")
</pallas_src>

<mosaic_0001>
module attributes {stable_mosaic.version = 11 : i64} {
  func.func @_ls_ce_kernel(%arg0: i32, %arg1: memref<8x32xf32, #tpu.memory_space<vmem>>, %arg2: memref<8x1xi32, #tpu.memory_space<vmem>>, %arg3: memref<1x8x128xf32, #tpu.memory_space<vmem>>) attributes {dimension_semantics = [#tpu.dimension_semantics<parallel>], iteration_bounds = array<i64: 1>, scalar_prefetch = 0 : i64, scratch_operands = 0 : i64, tpu.core_type = #tpu.core_type<tc>, window_params = [{transform_indices = @transform_0, window_bounds = array<i64: 8, 32>}, {transform_indices = @transform_1, window_bounds = array<i64: 8, 1>}, {transform_indices = @transform_2, window_bounds = array<i64: 1, 8, 128>}]} {
    %c0 = arith.constant 0 : index
    %c0_0 = arith.constant 0 : index
    %0 = vector.load %arg1[%c0, %c0_0] : memref<8x32xf32, #tpu.memory_space<vmem>>, vector<8x32xf32>
    %cst = arith.constant dense<0xFF800000> : vector<8xf32>
    %1 = vector.multi_reduction <maximumf>, %0, %cst [1] : vector<8x32xf32> to vector<8xf32>
    %2 = vector.shape_cast %1 : vector<8xf32> to vector<8x1xf32>
    %3 = vector.broadcast %2 : vector<8x1xf32> to vector<8x32xf32>
    %4 = arith.subf %0, %3 : vector<8x32xf32>
    %5 = math.exp %4 : vector<8x32xf32>
    %cst_1 = arith.constant dense<0.000000e+00> : vector<8xf32>
    %6 = vector.multi_reduction <add>, %5, %cst_1 [1] : vector<8x32xf32> to vector<8xf32>
    %7 = vector.shape_cast %6 : vector<8xf32> to vector<8x1xf32>
    %8 = math.log %7 : vector<8x1xf32>
    %9 = arith.addf %2, %8 : vector<8x1xf32>
    %c0_2 = arith.constant 0 : index
    %c0_3 = arith.constant 0 : index
    %10 = vector.load %arg2[%c0_2, %c0_3] : memref<8x1xi32, #tpu.memory_space<vmem>>, vector<8x1xi32>
    %11 = tpu.iota {dimensions = array<i32: 1>} : vector<1x32xi32>
    %12 = vector.broadcast %11 : vector<1x32xi32> to vector<8x32xi32>
    %13 = vector.broadcast %10 : vector<8x1xi32> to vector<8x32xi32>
    %14 = arith.cmpi eq, %12, %13 : vector<8x32xi32>
    %cst_4 = arith.constant 0.899999976 : f32
    %cst_5 = arith.constant 3.125000e-03 : f32
    %15 = arith.addf %cst_4, %cst_5 : f32
    %cst_6 = arith.constant 3.125000e-03 : f32
    %16 = vector.broadcast %15 : f32 to vector<8x32xf32>
    %17 = vector.broadcast %cst_6 : f32 to vector<8x32xf32>
    %18 = arith.select %14, %16, %17 : vector<8x32xi1>, vector<8x32xf32>
    %19 = arith.mulf %18, %0 : vector<8x32xf32>
    %cst_7 = arith.constant dense<0.000000e+00> : vector<8xf32>
    %20 = vector.multi_reduction <add>, %19, %cst_7 [1] : vector<8x32xf32> to vector<8xf32>
    %21 = vector.shape_cast %20 : vector<8xf32> to vector<8x1xf32>
    %22 = arith.subf %9, %21 : vector<8x1xf32>
    %c8_i32 = arith.constant 8 : i32
    %23 = arith.muli %arg0, %c8_i32 : i32
    %24 = tpu.iota {dimensions = array<i32: 0>} : vector<8x1xi32>
    %25 = vector.broadcast %23 : i32 to vector<8x1xi32>
    %26 = arith.addi %25, %24 : vector<8x1xi32>
    %c8_i32_8 = arith.constant 8 : i32
    %27 = vector.broadcast %c8_i32_8 : i32 to vector<8x1xi32>
    %28 = arith.cmpi slt, %26, %27 : vector<8x1xi32>
    %cst_9 = arith.constant 0.000000e+00 : f32
    %29 = vector.broadcast %cst_9 : f32 to vector<8x1xf32>
    %30 = arith.select %28, %22, %29 : vector<8x1xi1>, vector<8x1xf32>
    %31 = vector.shape_cast %30 : vector<8x1xf32> to vector<1x8x1xf32>
    %cst_10 = arith.constant dense<0.000000e+00> : vector<1xf32>
    %32 = vector.multi_reduction <add>, %31, %cst_10 [1, 2] : vector<1x8x1xf32> to vector<1xf32>
    %33 = vector.shape_cast %32 : vector<1xf32> to vector<1x1x1xf32>
    %34 = vector.extract %33[0, 0, 0] : f32 from vector<1x1x1xf32>
    %35 = vector.broadcast %34 : f32 to vector<1x8x128xf32>
    %c0_11 = arith.constant 0 : index
    %c0_12 = arith.constant 0 : index
    %c0_13 = arith.constant 0 : index
    %36 = vector.load %arg3[%c0_11, %c0_12, %c0_13] : memref<1x8x128xf32, #tpu.memory_space<vmem>>, vector<1x8x128xf32>
    tpu.vector_store %arg3[%c0_11, %c0_12, %c0_13], %35 {strides = array<i32>} : memref<1x8x128xf32, #tpu.memory_space<vmem>>, vector<1x8x128xf32>,
    return
  }
  func.func @transform_0(%arg0: i32) -> (i32, i32) {
    %c0_i32 = arith.constant 0 : i32
    %c0_i32_0 = arith.constant 0 : i32
    return %arg0, %c0_i32 : i32, i32
  }
  func.func @transform_1(%arg0: i32) -> (i32, i32) {
    %c0_i32 = arith.constant 0 : i32
    %c0_i32_0 = arith.constant 0 : i32
    return %arg0, %c0_i32 : i32, i32
  }
  func.func @transform_2(%arg0: i32) -> (i32, i32, i32) {
    %c0_i32 = arith.constant 0 : i32
    %c0_i32_0 = arith.constant 0 : i32
    %c0_i32_1 = arith.constant 0 : i32
    return %arg0, %c0_i32, %c0_i32_0 : i32, i32, i32
  }
}

</mosaic_0001>

<bundles_post_ra>
// kernel: tpu_custom_call.1
= control target key start
LH: loop header
LB: loop body
LE: loop exit
PB: predicated region body
PF: predicated region fallthrough
CT: control target
= control target key end

     0   :  { %vm13_vm0 = vcmask 261120   ;;  %s135_s0 = inlined_call_operand.vmem [shape: f32[8,32], index: 0, kind: input, shape index: {}]   ;;  %s136_s1 = inlined_call_operand.vmem [shape: s32[8,1], index: 1, kind: input, shape index: {}]   ;;  %s137_s2 = inlined_call_operand.hbm [shape: f32[1,8,128], index: 2, kind: output, shape index: {}]  }
   0x1   :  { %v12_v0 = vld [vmem:[%s135_s0] sm:$0xff] }
   0x2   :  { %7 = vsyncpa [#allocation3], 0  ;;  %v14_v1 = vsel %vm13_vm0, %v12_v0, -inf  ;;  %v105_v2 = vmov 0   ;;  %v26_v3 = vld [vmem:[%s136_s1] sm:$0xff]  ;;  %v27_v7 = vlaneseq  ;;  %vm46_vm2 = vcmask 7168  }
   0x3   :  { %78 = vset.pattern.permute.xlu0 %v105_v2  ;;  %v106_v10 = vmov 0.003125   ;;  %s107_s0 = smov [#allocation2]  }
   0x4   :  { %15 = vmax.xlane.f32.xlu0 %v14_v1  ;;  %v28_v8 = vand.u32 127, %v27_v7  ;;  %s65_s1 = sshll.u32 %s107_s0, 4  ;;  %s66_s1 = int_to_ptr.vmem [resolvable:$true] %s65_s1 }
   0x5   :  { %s83_s14 = scalar_lea.vmem %s66_s1, 128  ;;  %p88_p1 = scmp.lt.s32.totalorder %s66_s1, %s66_s1 }
   0x6   :  { %p84_p0 = scmp.ne.s32.totalorder %s66_s1, %s83_s14  ;;  %p89_p2 = scmp.lt.s32.totalorder %s83_s14, %s83_s14 }
   0x8   :  { %p90_p3 = por %p89_p2, %p88_p1 }
   0xa   :  { %p91_p4 = pnand %p90_p3, %p84_p0 }
  0x1a   :  { %30 = vperm.xlu0 %78, %v26_v3  }
  0x8d   :  { %v16_v4 = vpop.xlane.xlu0 %15 }
  0x8e   :  { %v17_v5 = vsub.f32 %v12_v0, %v16_v4 }
  0x90   :  { %v18_v6 = vmul.f32 1.442695, %v17_v5 }
  0x92   :  { %79 = vpow2.f32 %v18_v6 }
  0x95   :  { %v31_v9 = vpop.permute.xlu0 %30 }
  0x96   :  { %vm32_vm1 = vcmp.eq.s32.totalorder %v28_v8, %v31_v9 }
  0x97   :  { %v33_v11 = vsel %vm32_vm1, 0.903125, %v106_v10 }
  0x98   :  { %v34_v12 = vmul.f32 %v33_v11, %v12_v0 }
  0x9a   :  { %v35_v15 = vsel %vm13_vm0, %v34_v12, 0.0 }
  0x9f   :  { %v80_v13 = vpop.eup %79 }
  0xa0   :  { %v20_v14 = vsel %vm13_vm0, %v80_v13, 0.0 }
  0xa1   :  { %21 = vadd.xlane.f32.xlu1 %v20_v14 }
  0xa5   :  { %36 = vadd.xlane.f32.xlu1 %v35_v15 }
 0x12a   :  { %v22_v16 = vpop.xlane.xlu1 %21 }
 0x12b   :  { %81 = vlog2.f32 %v22_v16 }
 0x12e   :  { %v37_v19 = vpop.xlane.xlu1 %36 }
 0x138   :  { %v82_v17 = vpop.eup %81 }
 0x139   :  { %v24_v18 = vmul.f32 0.6931472, %v82_v17 }
 0x13b   :  { %v25_v20 = vadd.f32 %v24_v18, %v16_v4 }
 0x13d   :  { %v38_v21 = vsub.f32 %v25_v20, %v37_v19 }
 0x13f   :  { %v47_v22 = vsel %vm46_vm2, %v38_v21, 0.0 }
 0x140   :  { %48 = vadd.xlane.f32.xlu1 %v47_v22 }
 0x1c9   :  { %v49_v23 = vpop.xlane.xlu1 %48 }
 0x1ca   :  { %v50_v24 = vrot.slane %v49_v23, 4 }
 0x1cc   :  { %v51_v25 = vadd.f32 %v50_v24, %v49_v23 }
 0x1ce   :  { %v52_v26 = vrot.slane %v51_v25, 2 }
 0x1d0   :  { %v53_v27 = vadd.f32 %v52_v26, %v51_v25 }
 0x1d2   :  { %v54_v28 = vrot.slane %v53_v27, 1 }
 0x1d4   :  { %v55_v29 = vadd.f32 %v54_v28, %v53_v27 }
 0x1d6   :  { %73 = vpush %v55_v29 }
 0x207   :  { %s74_s13 = spop %73 }
 0x208   :  { %v57_v30 = vstv %s74_s13 }
 0x209   :  { %58 = vst [vmem:[#allocation2] sm:$0xff] %v57_v30 }
 0x20a   :  { %94 = shalt.err (!%p91_p4)
}
 0x20b   :  { %68 = dma.vmem_to_hbm [thread:$0]  %s66_s1, 128, %s137_s2, [#allocation3]  }
 0x20c   :  { %103 = dma.done.wait [#allocation3], 128  }
 0x20d   :  { %104 = vsyncadd [#allocation3], 4294967168 }
 0x20e   :  { %72 = vsyncpa [#allocation3], 1 }

</bundles_post_ra>
